<compile_context>
chip_gen: v7x
topology: tpu7x:2x2x1
jax: 0.10.0
libtpu: 0.0.40
codegen_flags: <defaults>
</compile_context>

<pallas_src>
import functools

import jax
import jax.numpy as jnp
from jax.experimental import pallas as pl
from jax.experimental.pallas import tpu as pltpu


def _cdiv(a, b):
    return -(-a // b)


# ----------------------------------------------------------------------------
# Kernels
# ----------------------------------------------------------------------------
def _conv_conv_kernel(cur_ref, nxt_ref, w_ref, b_ref, o_ref, *, k, pad, compute_dtype):
    """out[l, :] = bias + sum_t x[l + t, :] @ W[t]   (zero-padded past the end)."""
    cur = cur_ref[0]                                  # (TL, D)
    tl = cur.shape[0]
    d_out = w_ref.shape[2]
    if pad > 0:
        xp = jnp.concatenate([cur, nxt_ref[0][:pad, :]], axis=0)   # (TL + pad, D) halo append
    else:
        xp = cur
    xp = xp.astype(compute_dtype)
    acc = jnp.zeros((tl, d_out), jnp.float32) + b_ref[...].astype(jnp.float32)
    for t in range(k):                                # static unroll over taps
        acc = acc + jnp.dot(xp[t:t + tl, :],
                            w_ref[t].astype(compute_dtype),
                            preferred_element_type=jnp.float32)
    o_ref[0] = acc.astype(o_ref.dtype)


def _pool_kernel(cur_ref, nxt_ref, o_ref, *, k, pad, mode):
    """Sliding max / mean / sum over the sequence axis (window k, stride 1, right zero-pad)."""
    cur = cur_ref[0]                                  # (TL, D)
    tl = cur.shape[0]
    if pad > 0:
        xp = jnp.concatenate([cur, nxt_ref[0][:pad, :]], axis=0)
    else:
        xp = cur
    xp = xp.astype(jnp.float32)                       # elementwise in f32 (v5e VPU has no bf16)
    r = xp[0:tl, :]
    for t in range(1, k):
        win = xp[t:t + tl, :]
        r = jnp.maximum(r, win) if mode == "conv_max" else r + win
    if mode == "conv_mean":
        r = r * (1.0 / k)
    # conv_sum: AvgPool1d followed by * kernel_size == plain window sum
    o_ref[0] = r.astype(o_ref.dtype)


# ----------------------------------------------------------------------------
# Wrapper
# ----------------------------------------------------------------------------
def span_conv_block_forward(x, *, span_mode, kernel_size, weight=None, bias=None,
                            block_l=None, compute_dtype=None):
    B, L, D = x.shape
    k = int(kernel_size)
    pad = k - 1
    if compute_dtype is None:
        compute_dtype = x.dtype           # pass jnp.bfloat16 for 2-4x MXU throughput on v6e/v7x
    if block_l is None:
        block_l = min(L, 256)
    TL = max(8, _cdiv(block_l, 8) * 8)    # sublane-aligned L tile
    if pad > TL:
        # TODO(synk): multi-tile halo for kernel_size > block_l + 1 (not needed for typical sizes).
        raise NotImplementedError("kernel_size - 1 must fit inside one L tile")
    nT = _cdiv(L, TL)
    Lp = (nT + 1) * TL                    # extra zero tile = conv right-pad + halo of the last tile
    x_pad = jnp.pad(x, ((0, 0), (0, Lp - L), (0, 0)))

    cur_spec = pl.BlockSpec((1, TL, D), lambda b, l: (b, l, 0))
    nxt_spec = pl.BlockSpec((1, TL, D), lambda b, l: (b, l + 1, 0))      # halo rows from next tile
    cparams = pltpu.CompilerParams(dimension_semantics=("parallel", "parallel"))

    if span_mode == "conv_conv":
        d_out = weight.shape[2]
        kern = functools.partial(_conv_conv_kernel, k=k, pad=pad, compute_dtype=compute_dtype)
        out = pl.pallas_call(
            kern,
            out_shape=jax.ShapeDtypeStruct((B, nT * TL, d_out), x.dtype),
            grid_spec=pltpu.PrefetchScalarGridSpec(
                num_scalar_prefetch=0,
                grid=(B, nT),
                in_specs=[
                    cur_spec,
                    nxt_spec,
                    pl.BlockSpec((k, D, d_out), lambda b, l: (0, 0, 0)),   # resident weights
                    pl.BlockSpec((1, d_out), lambda b, l: (0, 0)),
                ],
                out_specs=pl.BlockSpec((1, TL, d_out), lambda b, l: (b, l, 0)),
            ),
            compiler_params=cparams,
        )(x_pad, x_pad, weight, bias)
    elif span_mode in ("conv_max", "conv_mean", "conv_sum"):
        kern = functools.partial(_pool_kernel, k=k, pad=pad, mode=span_mode)
        out = pl.pallas_call(
            kern,
            out_shape=jax.ShapeDtypeStruct((B, nT * TL, D), x.dtype),
            grid_spec=pltpu.PrefetchScalarGridSpec(
                num_scalar_prefetch=0,
                grid=(B, nT),
                in_specs=[cur_spec, nxt_spec],
                out_specs=pl.BlockSpec((1, TL, D), lambda b, l: (b, l, 0)),
            ),
            compiler_params=cparams,
        )(x_pad, x_pad)
    else:
        # TODO(synk): 'conv_normal' never defines self.conv in the reference module (its forward crashes).
        raise NotImplementedError(f"span_mode={span_mode!r} is not supported")

    if nT * TL != L:
        out = out[:, :L, :]
    return out


# ----------------------------------------------------------------------------
# Module wrapper (mirrors the PyTorch SpanConvBlock, eval-mode forward)
# ----------------------------------------------------------------------------
class SpanConvBlock:
    def __init__(self, hidden_size, kernel_size, span_mode="conv_normal", key=None):
        self.hidden_size = hidden_size
        self.kernel_size = int(kernel_size)
        self.span_mode = span_mode
        self.pad = self.kernel_size - 1
        self.weight = None
        self.bias = None
        if span_mode == "conv_conv":
            if key is None:
                key = jax.random.PRNGKey(0)
            kw, kb = jax.random.split(key)
            fan_in = hidden_size * self.kernel_size
            # Parameter init only (approximates nn.init.kaiming_uniform_); forward semantics unaffected.
            w_bound = (6.0 / fan_in) ** 0.5
            # MXU-friendly layout (k, D_in, D_out); a PyTorch Conv1d weight (D_out, D_in, k)
            # maps to this via w_torch.permute(2, 1, 0).
            self.weight = jax.random.uniform(
                kw, (self.kernel_size, hidden_size, hidden_size), jnp.float32, -w_bound, w_bound)
            b_bound = 1.0 / (fan_in ** 0.5)
            self.bias = jax.random.uniform(kb, (1, hidden_size), jnp.float32, -b_bound, b_bound)
        elif span_mode in ("conv_max", "conv_mean", "conv_sum"):
            pass
        else:
            # TODO(synk): 'conv_normal' defines no conv op in the reference module.
            raise NotImplementedError(f"span_mode={span_mode!r} is not supported")

    def __call__(self, x, block_l=None, compute_dtype=None):
        return span_conv_block_forward(
            x, span_mode=self.span_mode, kernel_size=self.kernel_size,
            weight=self.weight, bias=self.bias, block_l=block_l, compute_dtype=compute_dtype)

    # pure-JAX reference mirroring the PyTorch forward exactly
    # (transpose -> F.pad right with zeros -> conv/pool over L -> [*k for conv_sum] -> transpose)
    def reference(self, x):
        B, L, D = x.shape
        k, pad = self.kernel_size, self.pad
        xp = jnp.pad(x, ((0, 0), (0, pad), (0, 0)))
        wins = [xp[:, t:t + L, :] for t in range(k)]
        if self.span_mode == "conv_conv":
            out = jnp.zeros((B, L, D), jnp.float32) + self.bias[None, :, :]
            for t in range(k):
                out = out + jnp.einsum("bld,de->ble", wins[t], self.weight[t])
            return out.astype(x.dtype)
        if self.span_mode == "conv_max":
            r = wins[0]
            for w in wins[1:]:
                r = jnp.maximum(r, w)
            return r
        s = wins[0]
        for w in wins[1:]:
            s = s + w
        if self.span_mode == "conv_mean":
            return s / k
        return (s / k) * k                 # conv_sum: AvgPool1d output multiplied by kernel_size


if __name__ == "__main__":
    B, L, D, K = 2, 16, 32, 3
    key = jax.random.PRNGKey(0)
    kx, kp = jax.random.split(key)
    x = jax.random.normal(kx, (B, L, D), jnp.float32)

    for mode in ("conv_conv", "conv_max", "conv_mean", "conv_sum"):
        blk = SpanConvBlock(hidden_size=D, kernel_size=K, span_mode=mode, key=kp)
        # block_l=8 -> grid = (B, 2): exercises the L-tiling + halo path across the tile boundary.
        out = jax.block_until_ready(blk(x, block_l=8))
        ref = blk.reference(x)
        assert out.shape == (B, L, D), (mode, out.shape)
        assert jnp.allclose(out, ref, atol=1e-3, rtol=1e-3), f"mismatch vs reference for {mode}"

    print("KERNEL_OK")
</pallas_src>

<mosaic_0001>
module attributes {stable_mosaic.version = 11 : i64} {
  func.func @_conv_conv_kernel(%arg0: i32, %arg1: i32, %arg2: memref<1x8x32xf32, #tpu.memory_space<vmem>>, %arg3: memref<1x8x32xf32, #tpu.memory_space<vmem>>, %arg4: memref<3x32x32xf32, #tpu.memory_space<vmem>>, %arg5: memref<1x32xf32, #tpu.memory_space<vmem>>, %arg6: memref<1x8x32xf32, #tpu.memory_space<vmem>>) attributes {dimension_semantics = [#tpu.dimension_semantics<parallel>, #tpu.dimension_semantics<parallel>], iteration_bounds = array<i64: 2, 2>, scalar_prefetch = 0 : i64, scratch_operands = 0 : i64, tpu.core_type = #tpu.core_type<tc>, window_params = [{transform_indices = @transform_0, window_bounds = array<i64: 1, 8, 32>}, {transform_indices = @transform_1, window_bounds = array<i64: 1, 8, 32>}, {pipeline_mode = #tpu.pipeline_mode<synchronous>, transform_indices = @transform_2, window_bounds = array<i64: 3, 32, 32>}, {pipeline_mode = #tpu.pipeline_mode<synchronous>, transform_indices = @transform_3, window_bounds = array<i64: 1, 32>}, {transform_indices = @transform_4, window_bounds = array<i64: 1, 8, 32>}]} {
    %c0 = arith.constant 0 : index
    %c0_0 = arith.constant 0 : index
    %c0_1 = arith.constant 0 : index
    %0 = vector.load %arg2[%c0, %c0_0, %c0_1] : memref<1x8x32xf32, #tpu.memory_space<vmem>>, vector<1x8x32xf32>
    %1 = vector.shape_cast %0 : vector<1x8x32xf32> to vector<8x32xf32>
    %c0_2 = arith.constant 0 : index
    %c0_3 = arith.constant 0 : index
    %c0_4 = arith.constant 0 : index
    %2 = vector.load %arg3[%c0_2, %c0_3, %c0_4] : memref<1x8x32xf32, #tpu.memory_space<vmem>>, vector<1x8x32xf32>
    %3 = vector.shape_cast %2 : vector<1x8x32xf32> to vector<8x32xf32>
    %4 = vector.extract_strided_slice %3 {offsets = [0, 0], sizes = [2, 32], strides = [1, 1]} : vector<8x32xf32> to vector<2x32xf32>
    %5 = tpu.concatenate %1, %4 in 0 : vector<8x32xf32>, vector<2x32xf32> -> vector<10x32xf32>
    %cst = arith.constant 0.000000e+00 : f32
    %6 = vector.broadcast %cst : f32 to vector<8x32xf32>
    %c0_5 = arith.constant 0 : index
    %c0_6 = arith.constant 0 : index
    %7 = vector.load %arg5[%c0_5, %c0_6] : memref<1x32xf32, #tpu.memory_space<vmem>>, vector<1x32xf32>
    %8 = vector.broadcast %7 : vector<1x32xf32> to vector<8x32xf32>
    %9 = arith.addf %6, %8 : vector<8x32xf32>
    %10 = vector.extract_strided_slice %5 {offsets = [0, 0], sizes = [8, 32], strides = [1, 1]} : vector<10x32xf32> to vector<8x32xf32>
    %c0_7 = arith.constant 0 : index
    %c0_8 = arith.constant 0 : index
    %c0_9 = arith.constant 0 : index
    %11 = vector.load %arg4[%c0_7, %c0_8, %c0_9] : memref<3x32x32xf32, #tpu.memory_space<vmem>>, vector<1x32x32xf32>
    %12 = vector.shape_cast %11 : vector<1x32x32xf32> to vector<32x32xf32>
    %cst_10 = arith.constant dense<0.000000e+00> : vector<8x32xf32>
    %13 = tpu.matmul %10, %12, %cst_10 {dimension_numbers = #tpu.dot_dimension_numbers<[1], [0], [0], [1], [0, 0, 1, 1], [], []>} : vector<8x32xf32>, vector<32x32xf32>, vector<8x32xf32> -> vector<8x32xf32>
    %14 = arith.addf %9, %13 : vector<8x32xf32>
    %15 = vector.extract_strided_slice %5 {offsets = [1, 0], sizes = [8, 32], strides = [1, 1]} : vector<10x32xf32> to vector<8x32xf32>
    %c1 = arith.constant 1 : index
    %c0_11 = arith.constant 0 : index
    %c0_12 = arith.constant 0 : index
    %16 = vector.load %arg4[%c1, %c0_11, %c0_12] : memref<3x32x32xf32, #tpu.memory_space<vmem>>, vector<1x32x32xf32>
    %17 = vector.shape_cast %16 : vector<1x32x32xf32> to vector<32x32xf32>
    %cst_13 = arith.constant dense<0.000000e+00> : vector<8x32xf32>
    %18 = tpu.matmul %15, %17, %cst_13 {dimension_numbers = #tpu.dot_dimension_numbers<[1], [0], [0], [1], [0, 0, 1, 1], [], []>} : vector<8x32xf32>, vector<32x32xf32>, vector<8x32xf32> -> vector<8x32xf32>
    %19 = arith.addf %14, %18 : vector<8x32xf32>
    %20 = vector.extract_strided_slice %5 {offsets = [2, 0], sizes = [8, 32], strides = [1, 1]} : vector<10x32xf32> to vector<8x32xf32>
    %c2 = arith.constant 2 : index
    %c0_14 = arith.constant 0 : index
    %c0_15 = arith.constant 0 : index
    %21 = vector.load %arg4[%c2, %c0_14, %c0_15] : memref<3x32x32xf32, #tpu.memory_space<vmem>>, vector<1x32x32xf32>
    %22 = vector.shape_cast %21 : vector<1x32x32xf32> to vector<32x32xf32>
    %cst_16 = arith.constant dense<0.000000e+00> : vector<8x32xf32>
    %23 = tpu.matmul %20, %22, %cst_16 {dimension_numbers = #tpu.dot_dimension_numbers<[1], [0], [0], [1], [0, 0, 1, 1], [], []>} : vector<8x32xf32>, vector<32x32xf32>, vector<8x32xf32> -> vector<8x32xf32>
    %24 = arith.addf %19, %23 : vector<8x32xf32>
    %c0_17 = arith.constant 0 : index
    %c0_18 = arith.constant 0 : index
    %c0_19 = arith.constant 0 : index
    %25 = vector.load %arg6[%c0_17, %c0_18, %c0_19] : memref<1x8x32xf32, #tpu.memory_space<vmem>>, vector<1x8x32xf32>
    %26 = vector.shape_cast %25 : vector<1x8x32xf32> to vector<8x32xf32>
    %27 = vector.shape_cast %24 : vector<8x32xf32> to vector<1x8x32xf32>
    tpu.vector_store %arg6[%c0_17, %c0_18, %c0_19], %27 {strides = array<i32>} : memref<1x8x32xf32, #tpu.memory_space<vmem>>, vector<1x8x32xf32>,
    return
  }
  func.func @transform_0(%arg0: i32, %arg1: i32) -> (i32, i32, i32) {
    %c0_i32 = arith.constant 0 : i32
    %c0_i32_0 = arith.constant 0 : i32
    return %arg0, %arg1, %c0_i32 : i32, i32, i32
  }
  func.func @transform_1(%arg0: i32, %arg1: i32) -> (i32, i32, i32) {
    %c1_i32 = arith.constant 1 : i32
    %0 = arith.addi %arg1, %c1_i32 : i32
    %c0_i32 = arith.constant 0 : i32
    %c0_i32_0 = arith.constant 0 : i32
    return %arg0, %0, %c0_i32 : i32, i32, i32
  }
  func.func @transform_2(%arg0: i32, %arg1: i32) -> (i32, i32, i32) {
    %c0_i32 = arith.constant 0 : i32
    %c0_i32_0 = arith.constant 0 : i32
    %c0_i32_1 = arith.constant 0 : i32
    %c0_i32_2 = arith.constant 0 : i32
    return %c0_i32, %c0_i32_0, %c0_i32_1 : i32, i32, i32
  }
  func.func @transform_3(%arg0: i32, %arg1: i32) -> (i32, i32) {
    %c0_i32 = arith.constant 0 : i32
    %c0_i32_0 = arith.constant 0 : i32
    %c0_i32_1 = arith.constant 0 : i32
    return %c0_i32, %c0_i32_0 : i32, i32
  }
  func.func @transform_4(%arg0: i32, %arg1: i32) -> (i32, i32, i32) {
    %c0_i32 = arith.constant 0 : i32
    %c0_i32_0 = arith.constant 0 : i32
    return %arg0, %arg1, %c0_i32 : i32, i32, i32
  }
}

</mosaic_0001>

<bundles_post_ra>
// kernel: tpu_custom_call.1
= control target key start
LH: loop header
LB: loop body
LE: loop exit
PB: predicated region body
PF: predicated region fallthrough
CT: control target
= control target key end

     0   :  { %s1509_s0 = inlined_call_operand.hbm [shape: f32[2,24,32], index: 0, kind: input, shape index: {}]   ;;  %s1510_s1 = inlined_call_operand.hbm [shape: f32[2,24,32], index: 1, kind: input, shape index: {}]   ;;  %s1511_s2 = inlined_call_operand.hbm [shape: f32[3,32,32], index: 2, kind: input, shape index: {}]   ;;  %s1512_s3 = inlined_call_operand.vmem [shape: f32[1,32], index: 3, kind: input, shape index: {}]   ;;  %s1513_s4 = inlined_call_operand.hbm [shape: f32[2,16,32], index: 4, kind: output, shape index: {}]  }
   0x1   :  { %1526 = sst [smem:[#allocation18_spill]] %s1511_s2 }
   0x2   :  { %1527 = sst [smem:[#allocation19_spill]] %s1512_s3 }
   0x3   :  { %1528 = sst [smem:[#allocation20_spill]] %s1513_s4 }
   0x4   :  { %9 = vsyncpa [#allocation3], 0 }
   0x5   :  { %11 = vsyncpa [#allocation3 + $0x1], 0 }
   0x6   :  { %12 = vsyncpa [#allocation6], 0 }
   0x7   :  { %14 = vsyncpa [#allocation6 + $0x1], 0 }
   0x8   :  { %15 = vsyncpa [#allocation4], 0 }
   0x9   :  { %17 = vsyncpa [#allocation4 + $0x1], 0  ;;  %s1153_s15 = smov 0   ;;  %s1155_s16 = smov 0  }
   0xa   :  { %s1157_s17 = smov 0   ;;  %s1159_s18 = smov 0  }
   0xb   :  { %s1161_s19 = smov 0   ;;  %s1163_s20 = smov 0  }
   0xc   :  { %s1165_s21 = smov 0   ;;  %s1167_s22 = smov 0  }
   0xd   :  { %s1169_s23 = smov 0   ;;  %s1171_s24 = smov 0  }
   0xe   :  { %s1173_s25 = smov 0  }
   0xf LB: > { %1529 = sst [smem:[#allocation13_spill]] %s1113_s24  ;;  %s1209_s26 = sadd.s32 4294967295, %s1117_s25   ;;  %s1117_s25 = sphi %s1173_s25, %s23_s25   ;;  %s1113_s24 = sphi %s1171_s24, %s1561_s24   ;;  %s1109_s23 = sphi %s1169_s23, %s1569_s23   ;;  %s1105_s22 = sphi %s1167_s22, %s1559_s22   ;;  %s1101_s21 = sphi %s1165_s21, %s1568_s21   ;;  %s1097_s20 = sphi %s1163_s20, %s1567_s20   ;;  %s1093_s19 = sphi %s1161_s19, %s1566_s19   ;;  %s1089_s18 = sphi %s1159_s18, %s1565_s18   ;;  %s1085_s17 = sphi %s1157_s17, %s1564_s17   ;;  %s1081_s16 = sphi %s1155_s16, %s1563_s16   ;;  %s1077_s15 = sphi %s1153_s15, %s1562_s15  }
  0x10   : > { %p683_p0 = scmp.ge.s32.totalorder %s1117_s25, 1  ;;  %p1514_p1 = scmp.eq.s32.totalorder %s1209_s26, 0 }
  0x11   : > { %p168_p2 = scmp.lt.s32.totalorder %s1117_s25, 5  ;;  %s1119_s28 = smov [#allocation7]  }
  0x12   : > { %s180_s29 = sshll.u32 %s1119_s28, 4  ;;  %s1532_s2 = sld [smem:[#allocation18_spill]]  ;;  %s181_s29 = int_to_ptr.vmem [resolvable:$true] %s180_s29 }
  0x13   : > { %p1214_p3 = pnand %p683_p0, %p168_p2 }
  0x15   : > { %s1530_s27 = scalar_select %p1214_p3, 1, 0 }
  0x16   : > { %p785_p4 = pneg %p1214_p3 }
  0x18   : > { %p1222_p5 = pnand %p785_p4, %p1514_p1  ;;  %s898_s7 = scalar_lea.hbm %s1532_s2, 1536 }
  0x19   : > { %p899_p6 = scmp.ne.s32.totalorder %s1532_s2, %s898_s7  ;;  %p905_p10 = scmp.lt.u32.totalorder %s898_s7, %s1532_s2 }
  0x1a   : > { %p900_p7 = pneg %p1222_p5 }
  0x1c   : > { %p901_p8 = pnand %p900_p7, %p899_p6 }
  0x1e   : > { %p902_p9 = pneg %p901_p8 }
  0x20   : > { %p907_p11 = pnand %p905_p10, %p902_p9 }
  0x22   : > { %910 = shalt.err (!%p907_p11)
}
  0x23   : > { %s911_s12 = scalar_lea.vmem %s181_s29, 1536  ;;  %p919_p2 = scmp.lt.s32.totalorder %s181_s29, %s181_s29 }
  0x24   : > { %p912_p12 = scmp.ne.s32.totalorder %s181_s29, %s911_s12  ;;  %p920_p4 = scmp.lt.s32.totalorder %s911_s12, %s911_s12 }
  0x26   : > { %p914_p13 = pnand %p912_p12, %p900_p7  ;;  %p921_p1 = por %p920_p4, %p919_p2 }
  0x28   : > { %p915_p0 = pneg %p914_p13 }
  0x2a   : > { %p922_p3 = pnand %p921_p1, %p915_p0 }
  0x2c   : > { %925 = shalt.err (!%p922_p3)
}
  0x2d   : > { %s1120_s13 = smov 128   ;;  %s1121_s14 = smov 8  }
  0x2e   : > { %788 = dma.hbm_to_vmem [thread:$0]  (!%p1222_p5), %s1532_s2, 1536, %s181_s29, [#allocation6], %s1120_s13, %s1120_s13, %s1121_s14  }
  0x2f   : > { %s682_s6 = sadd.s32 4294967294, %s1117_s25   ;;  %s32_s7 = sadd.s32 1, %s1109_s23 }
  0x30   : > { %s35_s8 = sadd.s32 1, %s1113_s24  ;;  %p33_p1 = scmp.ge.s32.totalorder %s32_s7, 2 }
  0x31   : > { %s44_s9 = sadd.s32 1, %s1097_s20  ;;  %p51_p3 = scmp.ne.s32.totalorder %s1097_s20, %s1093_s19 }
  0x32   : > { %p1523_p6 = scmp.eq.s32.totalorder %s1117_s25, 0  ;;  %s1571_s8 = smov (!%p33_p1, %s35_s8), %s1113_s24 }
  0x33   : > { %s1249_s10 = scalar_select %p33_p1, 0, %s32_s7  }
  0x34   : > { %p1259_p5 = por %p1523_p6, %p51_p3  ;;  %p37_p7 = scmp.ge.s32.totalorder %s1571_s8, 2 }
  0x35   : > { %1533 = sst [smem:[#allocation14_spill]] %s1249_s10  ;;  %s40_s30 = ssub.s32 %s1109_s23, %s1249_s10 }
  0x36   : > { %p57_p8 = scmp.ne.s32.totalorder %s1093_s19, %s1089_s18  ;;  %s68_s11 = sadd.s32 1, %s1249_s10 }
  0x37   : > { %p155_p9 = scmp.eq.s32.totalorder %s1209_s26, 3  ;;  %s1573_s8 = smov (%p37_p7, %s1571_s8), 0 }
  0x38   : > { %1535 = sst [smem:[#allocation15_spill]] %s1573_s8  ;;  %p1536_p10 = scmp.eq.s32.totalorder %s1209_s26, 0 }
  0x39   : > { %s70_s13 = ssub.s32 %s32_s7, %s68_s11  ;;  %s39_s14 = ssub.s32 %s1113_s24, %s1573_s8 }
  0x3a   : > { %p1274_p11 = por %p1536_p10, %p57_p8  ;;  %p1283_p12 = por %p155_p9, %p51_p3 }
  0x3b   : > { %s41_s5 = sor.u32 %s40_s30, %s39_s14  ;;  %s71_s2 = sor.u32 %s70_s13, %s39_s14 }
  0x3c   : > { %s1537_s12 = scalar_select %p1274_p11, 1, 0 }
  0x3d   : > { %s1538_s28 = scalar_select %p1283_p12, 1, 0 }
  0x3e   : > { %p42_p13 = scmp.eq.s32.totalorder %s41_s5, 0  ;;  %p1287_p0 = scmp.eq.s32.totalorder %s71_s2, 0 }
  0x3f   : > { %1539 = sst [smem:[#allocation16_spill]] %s1538_s28  ;;  %p161_p2 = scmp.eq.s32.totalorder %s682_s6, 3 }
  0x40   : > { %p1522_p4 = scmp.lt.s32.totalorder %s1117_s25, 4  ;;  %s197_s11 = sand.u32 1, %s1097_s20  }
  0x41   : > { %s1293_s4 = scalar_select %p42_p13, %s1097_s20, %s44_s9  }
  0x42   : > { %p1298_p1 = por %p161_p2, %p57_p8  ;;  %s686_s8 = sshll.u32 %s197_s11, 3 }
  0x43   : > { %1541 = sst [smem:[#allocation17_spill]] %s1293_s4  ;;  %s774_s3 = smul.u32 3, %s1113_s24 }
  0x44   : > { %s1542_s7 = scalar_select %p1298_p1, 1, 0 }
  0x45   : > { %s201_s28 = scalar_lea.vmem [#allocation2], %s686_s8  ;;  %p1308_p3 = pnand %p1522_p4, %p1259_p5 }
  0x46   : > { %s210_s30 = sshll.u32 %s201_s28, 4  ;;  %s206_s6 = sadd.s32 %s1109_s23, %s774_s3  ;;  %s1313_s30 = int_to_ptr.vmem [resolvable:$true] %s210_s30 }
  0x47   : > { %s687_s9 = sshll.u32 %s206_s6, 7  ;;  %s198_s28 = scalar_lea.sflag [#allocation3], %s197_s11 }
  0x48   : > { %s1318_s5 = scalar_lea.hbm %s1509_s0, %s687_s9  ;;  %s1323_s29 = scalar_lea.hbm %s1510_s1, %s687_s9 }
  0x49   : > { %s926_s4 = scalar_lea.hbm %s1318_s5, 128  ;;  %p928_p7 = pneg %p1308_p3 }
  0x4a   : > { %p927_p5 = scmp.ne.s32.totalorder %s1318_s5, %s926_s4  ;;  %s931_s13 = scalar_lea.hbm %s1509_s0, 768 }
  0x4b   : > { %p932_p10 = scmp.lt.u32.totalorder %s1318_s5, %s1509_s0  ;;  %p933_p13 = scmp.lt.u32.totalorder %s931_s13, %s926_s4 }
  0x4c   : > { %p929_p8 = pnand %p928_p7, %p927_p5  ;;  %p935_p4 = scmp.lt.u32.totalorder %s926_s4, %s1318_s5 }
  0x4d   : > { %p934_p2 = por %p933_p13, %p932_p10 }
  0x4e   : > { %p930_p9 = pneg %p929_p8 }
  0x4f   : > { %p936_p6 = por %p935_p4, %p934_p2 }
  0x51   : > { %p937_p1 = pnand %p936_p6, %p930_p9 }
  0x53   : > { %940 = shalt.err (!%p937_p1)
}
  0x54   : > { %s941_s11 = scalar_lea.vmem %s1313_s30, 128  ;;  %s1122_s9 = smov [#allocation2]  }
  0x55   : > { %p942_p5 = scmp.ne.s32.totalorder %s1313_s30, %s941_s11  ;;  %s946_s8 = sshll.u32 %s1122_s9, 4  ;;  %s947_s8 = int_to_ptr.vmem [resolvable:$false] %s946_s8 }
  0x56   : > { %s948_s3 = scalar_lea.vmem %s947_s8, 256  ;;  %p949_p11 = scmp.lt.s32.totalorder %s1313_s30, %s947_s8 }
  0x57   : > { %p944_p8 = pnand %p942_p5, %p928_p7  ;;  %p950_p10 = scmp.lt.s32.totalorder %s948_s3, %s941_s11 }
  0x59   : > { %p945_p12 = pneg %p944_p8  ;;  %p951_p13 = por %p950_p10, %p949_p11 }
  0x5b   : > { %p952_p4 = pnand %p951_p13, %p945_p12 }
  0x5d   : > { %955 = shalt.err (!%p952_p4)
}
  0x5e   : > { %792 = dma.hbm_to_vmem [thread:$0]  (!%p1308_p3), %s1318_s5, 128, %s1313_s30, %s198_s28  }
  0x5f   : > { %s74_s4 = sadd.s32 1, %s1085_s17  ;;  %p81_p6 = scmp.ne.s32.totalorder %s1085_s17, %s1081_s16 }
  0x60   : > { %s1356_s2 = scalar_select %p1287_p0, %s1085_s17, %s74_s4  }
  0x61   : > { %p1544_p11 = scmp.eq.s32.totalorder %s1117_s25, 0  ;;  %p87_p1 = scmp.ne.s32.totalorder %s1081_s16, %s1077_s15 }
  0x62   : > { %s217_s6 = sand.u32 1, %s1117_s25   ;;  %s219_s13 = sand.u32 1, %s1085_s17  }
  0x63   : > { %p83_p12 = por %p81_p6, %p1544_p11  ;;  %p1545_p7 = scmp.eq.s32.totalorder %s1209_s26, 0 }
  0x64   : > { %s688_s14 = sshll.u32 %s219_s13, 3  ;;  %s1371_s11 = scalar_lea.hbm %s1323_s29, 128 }
  0x65   : > { %p1366_p9 = por %p87_p1, %p1545_p7  ;;  %p1547_p3 = scmp.lt.s32.totalorder %s1117_s25, 4 }
  0x66   : > { %s221_s15 = scalar_lea.vmem [#allocation5], %s688_s14  ;;  %s218_s5 = scalar_lea.sflag [#allocation6], %s217_s6 }
  0x67   : > { %p1375_p2 = pnand %p1547_p3, %p83_p12  ;;  %s231_s30 = sshll.u32 %s221_s15, 4  ;;  %s1379_s30 = int_to_ptr.vmem [resolvable:$true] %s231_s30 }
  0x68   : > { %s986_s28 = scalar_lea.hbm %s1323_s29, 256  ;;  %s961_s3 = scalar_lea.hbm %s1510_s1, 768 }
  0x69   : > { %p957_p0 = scmp.ne.s32.totalorder %s1371_s11, %s986_s28  ;;  %p958_p5 = pneg %p1375_p2 }
  0x6a   : > { %p962_p13 = scmp.lt.u32.totalorder %s1371_s11, %s1510_s1  ;;  %p963_p4 = scmp.lt.u32.totalorder %s961_s3, %s986_s28 }
  0x6b   : > { %p959_p8 = pnand %p958_p5, %p957_p0  ;;  %p965_p11 = scmp.lt.u32.totalorder %s986_s28, %s1371_s11 }
  0x6c   : > { %p964_p6 = por %p963_p4, %p962_p13 }
  0x6d   : > { %p960_p10 = pneg %p959_p8 }
  0x6e   : > { %p966_p12 = por %p965_p11, %p964_p6 }
  0x70   : > { %p967_p1 = pnand %p966_p12, %p960_p10 }
  0x72   : > { %970 = shalt.err (!%p967_p1)
}
  0x73   : > { %s971_s29 = scalar_lea.vmem %s1379_s30, 128  ;;  %s1123_s6 = smov [#allocation5]  }
  0x74   : > { %p972_p7 = scmp.ne.s32.totalorder %s1379_s30, %s971_s29  ;;  %s976_s14 = sshll.u32 %s1123_s6, 4  ;;  %s977_s14 = int_to_ptr.vmem [resolvable:$false] %s976_s14 }
  0x75   : > { %s978_s15 = scalar_lea.vmem %s977_s14, 256  ;;  %p979_p8 = scmp.lt.s32.totalorder %s1379_s30, %s977_s14 }
  0x76   : > { %p974_p3 = pnand %p972_p7, %p958_p5  ;;  %p980_p13 = scmp.lt.s32.totalorder %s978_s15, %s971_s29 }
  0x78   : > { %p975_p0 = pneg %p974_p3  ;;  %p981_p4 = por %p980_p13, %p979_p8 }
  0x7a   : > { %p982_p6 = pnand %p981_p4, %p975_p0 }
  0x7c   : > { %985 = shalt.err (!%p982_p6)
}
  0x7d   : > { %795 = dma.hbm_to_vmem [thread:$0]  (!%p1375_p2), %s1371_s11, 128, %s1379_s30, %s218_s5  }
  0x7e   : > { %p1549_p10 = scmp.ne.s32.totalorder %s1530_s27, 0 }
  0x7f   : > { %s1409_s28 = sand.u32 (!%p1549_p10), 1, %s1093_s19   ;;  %p1550_p5 = scmp.ne.s32.totalorder (!%p1549_p10), %s1537_s12, 0 }
  0x80   : > { %240 = sbr.rel (%p1549_p10) target bundleno = 389 (0x185), region = 36  ;;  %s691_s9 = sshll.u32 (!%p1549_p10), %s1409_s28, 3 }
  0x81   : > { %s243_s8 = scalar_lea.sflag (!%p1549_p10), [#allocation3], %s1409_s28  ;;  %s246_s3 = scalar_lea.vmem (!%p1549_p10), [#allocation2], %s691_s9 }
  0x87   : > { %1060 = dma.done.wait (%p1550_p5), %s243_s8, 128  }
  0x88   : > { %1062 = vsyncadd (%p1550_p5), %s243_s8, 4294967168  ;;  %s251_s27 = sand.u32 1, %s1209_s26   ;;  %s253_s11 = sand.u32 1, %s1081_s16  }
  0x89   : > { %s692_s10 = sshll.u32 %s253_s11, 3  ;;  %s252_s30 = scalar_lea.sflag [#allocation6], %s251_s27 }
  0x8a   : > { %s255_s5 = scalar_lea.vmem [#allocation5], %s692_s10 }
  0x8b   : > { %1064 = dma.done.wait (%p1366_p9), %s252_s30, 128  }
  0x8c   : > { %1066 = vsyncadd (%p1366_p9), %s252_s30, 4294967168  ;;  %p1551_p2 = scmp.eq.s32.totalorder %s1209_s26, 0 }
  0x8e   : > { %1068 = dma.done.wait (%p1551_p2), [#allocation6], 1536   ;;  %p1552_p11 = pmov %p1551_p2 }
  0x8f   : > { %v1124_v0 = vmov 0.0|0.0   ;;  %vm1125_vm0 = vmmov 0   ;;  %v1126_v1 = vmov 0.0   ;;  %v380_v2 = vld [vmem:[#allocation7 + $0x20] sm:$0xff]  ;;  %v381_v3 = vld [vmem:[#allocation7 + $0x28] sm:$0xff]  ;;  %v382_v4 = vld [vmem:[#allocation7 + $0x30] sm:$0xff] }
  0x90   : > { %1070 = vsyncadd (%p1552_p11), [#allocation6], 4294965760  ;;  %758 = vmatprep.subr.bf16.mxu0 %v1124_v0  ;;  %752 = vmatprep.subr.bf16.mxu1 %v1124_v0  ;;  %v759_v5 = vpack.c.bf16 %v381_v3, %v380_v2  ;;  %v383_v6 = vld [vmem:[#allocation7 + $0x38] sm:$0xff]  ;;  %v300_v7 = vld [vmem:[#allocation7] sm:$0xff]  ;;  %vm385_vm1 = vcmask 1046528   ;;  %vm304_vm2 = vcmask 261120  }
  0x91   : > { %738 = vmatprep.mubr.msk.f32.mxu0 %vm1125_vm0, %v1126_v1  ;;  %727 = vmatprep.mubr.msk.f32.mxu1 %vm1125_vm0, %v1126_v1  ;;  %v301_v8 = vld [vmem:[#allocation7 + $0x8] sm:$0xff]  ;;  %v291_v11 = vld [vmem:[%s255_s5] sm:$0xff]  ;;  %v762_v12 = vpack.c.bf16 %v383_v6, %v382_v4  ;;  %v463_v17 = vld [vmem:[#allocation7 + $0x40] sm:$0xff]  ;;  %vm467_vm3 = vcmask 1045504   ;;  %s700_s26 = sshll.u32 %s1105_s22, 1  ;;  %s1553_s4 = sld [smem:[#allocation19_spill]] }
  0x92   : > { %v753_v9 = vpack.c.bf16 %v301_v8, %v300_v7  ;;  %v290_v10 = vld [vmem:[%s246_s3] sm:$0xff]  ;;  %760 = vmatpush3.bf16.msra.mxu0 %v759_v5  ;;  %v387_v14 = vrot.slane %v291_v11, 1  ;;  %v302_v15 = vld [vmem:[#allocation7 + $0x10] sm:$0xff]  ;;  %v303_v16 = vld [vmem:[#allocation7 + $0x18] sm:$0xff]  ;;  %v469_v24 = vrot.slane %v291_v11, 2  ;;  %s1554_s13 = sld [smem:[#allocation16_spill]]  ;;  %s557_s29 = sadd.s32 %s1101_s21, %s700_s26 }
  0x93   : > { %v386_v13 = vrot.slane %v290_v10, 1  ;;  %761 = vmatprep.subr.bf16.mxu0 %v1124_v0  ;;  %v464_v18 = vld [vmem:[#allocation7 + $0x48] sm:$0xff]  ;;  %v756_v19 = vpack.c.bf16 %v303_v16, %v302_v15  ;;  %v465_v22 = vld [vmem:[#allocation7 + $0x50] sm:$0xff]  ;;  %v466_v23 = vld [vmem:[#allocation7 + $0x58] sm:$0xff]  ;;  %v468_v26 = vrot.slane %v290_v10, 2  ;;  %s701_s6 = sshll.u32 %s557_s29, 7 }
  0x94   : > { %754 = vmatpush3.bf16.msra.mxu1 %v753_v9  ;;  %v765_v21 = vpack.c.bf16 %v464_v18, %v463_v17  ;;  %v768_v25 = vpack.c.bf16 %v466_v23, %v465_v22  ;;  %s288_s14 = scalar_lea.vmem [#allocation8], %s691_s9  ;;  %s1555_s27 = sld [smem:[#allocation20_spill]] }
  0x95   : > { %755 = vmatprep.subr.bf16.mxu1 %v1124_v0  ;;  %v388_v20 = vsel %vm385_vm1, %v386_v13, %v387_v14  ;;  %v470_v27 = vsel %vm467_vm3, %v468_v26, %v469_v24  ;;  %s561_s15 = sshll.u32 %s288_s14, 4  ;;  %s546_s21 = scalar_lea.sflag [#allocation4], %s1409_s28  ;;  %s1447_s15 = int_to_ptr.vmem [resolvable:$true] %s561_s15 }
  0x96   : > { %763 = vmatpush3.bf16.msra.mxu0 %v762_v12  ;;  %s987_s11 = scalar_lea.vmem %s1447_s15, 128  ;;  %s1127_s9 = smov [#allocation8]  }
  0x97   : > { %764 = vmatprep.subr.bf16.mxu0 %v1124_v0  ;;  %v695_v29 = vld [vmem:[%s1553_s4] ss:$0 sm:$0xff]  ;;  %p988_p9 = scmp.ne.s32.totalorder %s1447_s15, %s987_s11  ;;  %s991_s10 = sshll.u32 %s1127_s9, 4  ;;  %s992_s10 = int_to_ptr.vmem [resolvable:$false] %s991_s10 }
  0x98   : > { %757 = vmatpush3.bf16.msra.mxu1 %v756_v19  ;;  %p1556_p12 = scmp.ne.s32.totalorder %s1554_s13, 0  ;;  %s993_s30 = scalar_lea.vmem %s992_s10, 256 }
  0x99   : > { %739 = vmatmul.mubr.msk.f32.vlgmr.msra.gmra.mrb[0].mxu0 %vm304_vm2, %v388_v20  ;;  %p994_p3 = scmp.lt.s32.totalorder %s1447_s15, %s992_s10  ;;  %p995_p0 = scmp.lt.s32.totalorder %s993_s30, %s987_s11 }
  0x9a   : > { %766 = vmatpush3.bf16.msra.mxu0 %v765_v21  ;;  %749 = vmatprep.mubr.msk.f32.mxu0 %vm1125_vm0, %v1126_v1  ;;  %s1445_s22 = scalar_lea.hbm %s1555_s27, %s701_s6  ;;  %p989_p1 = pnand %p988_p9, %p1556_p12 }
  0x9b   : > { %728 = vmatmul.mubr.msk.f32.vlgmr.msra.gmra.mrb[0].mxu1 %vm304_vm2, %v290_v10  ;;  %767 = vmatprep.subr.bf16.mxu0 %v1124_v0  ;;  %p996_p8 = por %p995_p0, %p994_p3 }
  0x9c   : > { %p990_p7 = pneg %p989_p1 }
  0x9e   : > { %769 = vmatpush3.bf16.msra.mxu0 %v768_v25  ;;  %p997_p13 = pnand %p996_p8, %p990_p7 }
  0xa1   : > { %750 = vmatmul.mubr.msk.f32.vlgmr.msra.gmra.mrb[0].mxu0 %vm304_vm2, %v470_v27 }
 0x16e   : > { %v374_v28 = vpop.f32.mrb[0].mxu1 }
 0x16f   : > { %v729_v30 = vpop.f32.mrb[1].mxu1  ;;  %v378_v31 = vadd.f32 %v695_v29, %v374_v28 }
 0x174   : > { %v539_v32 = vpop.f32.mrb[0].mxu0 }
 0x175   : > { %v771_v33 = vadd.f32 %v539_v32, %v378_v31  ;;  %v751_v34 = vpop.f32.mrb[1].mxu0 }
 0x177   : > { %544 = vst.msk [vmem:[%s288_s14] sm:$0xff] %vm304_vm2, %v771_v33 }
 0x178   : > { %1000 = shalt.err (!%p997_p13)
}
 0x179   : > { %s1001_s28 = scalar_lea.hbm %s1445_s22, 128  ;;  %s1005_s12 = scalar_lea.hbm %s1555_s27, 512 }
 0x17a   : > { %p1002_p4 = scmp.ne.s32.totalorder %s1445_s22, %s1001_s28  ;;  %p1006_p5 = scmp.lt.u32.totalorder %s1445_s22, %s1555_s27 }
 0x17b   : > { %p1007_p2 = scmp.lt.u32.totalorder %s1005_s12, %s1001_s28  ;;  %p1009_p9 = scmp.lt.u32.totalorder %s1001_s28, %s1445_s22 }
 0x17c   : > { %p1003_p6 = pnand %p1002_p4, %p1556_p12 }
 0x17d   : > { %p1008_p11 = por %p1007_p2, %p1006_p5 }
 0x17e   : > { %p1004_p10 = pneg %p1003_p6 }
 0x17f   : > { %p1010_p1 = por %p1009_p9, %p1008_p11 }
 0x181   : > { %p1011_p7 = pnand %p1010_p1, %p1004_p10 }
 0x183   : > { %1014 = shalt.err (!%p1011_p7)
}
 0x184   : > { %783 = dma.vmem_to_hbm [thread:$0]  (%p1556_p12), %s1447_s15, 128, %s1445_s22, %s546_s21  }
 0x185 PF: > { %p803_p3 = scmp.ge.s32.totalorder %s1117_s25, 2  ;;  %s573_s29 = sand.u32 1, %s1089_s18  }
 0x186   : > { %p1557_p0 = scmp.ne.s32.totalorder %s1542_s7, 0  ;;  %s574_s6 = scalar_lea.sflag [#allocation4], %s573_s29 }
 0x188   : > { %p797_p8 = pnand %p803_p3, %p1557_p0 }
 0x18a   : > { %1072 = dma.done.wait (!%p797_p8), %s574_s6, 128  }
 0x18b   : > { %1074 = vsyncadd (!%p797_p8), %s574_s6, 4294967168  ;;  %s23_s25 = sadd.s32 1, %s1117_s25   ;;  %s1558_s13 = sld [smem:[#allocation17_spill]] }
 0x18c   : > { %p20_p13 = scmp.ge.s32.totalorder %s23_s25, 6   ;;  %s1559_s22 = sld [smem:[#allocation13_spill]] }
 0x18d   : > { %s1560_s14 = sld [smem:[#allocation14_spill]]  ;;  %s1561_s24 = sld [smem:[#allocation15_spill]] }
 0x18e   : > { %s1562_s15 = smov %s1081_s16  ;;  %s1563_s16 = smov %s1085_s17 }
 0x18f   : > { %s1564_s17 = smov %s1356_s2  ;;  %s1565_s18 = smov %s1093_s19 }
 0x190   : > { %s1566_s19 = smov %s1097_s20  ;;  %s1568_s21 = smov %s1109_s23 }
 0x191   : > { %s1567_s20 = smov %s1558_s13  ;;  %22 = sbr.rel (!%p20_p13) target bundleno = 15 (0xf), region = 100 }
 0x193   : > { %s1569_s23 = smov %s1560_s14 }
 0x198   :  { %579 = vsyncpa [#allocation3], 1 }
 0x199   :  { %581 = vsyncpa [#allocation3 + $0x1], 1 }
 0x19a   :  { %582 = vsyncpa [#allocation6], 1 }
 0x19b   :  { %584 = vsyncpa [#allocation6 + $0x1], 1 }
 0x19c   :  { %585 = vsyncpa [#allocation4], 1 }
 0x19d   :  { %587 = vsyncpa [#allocation4 + $0x1], 1 }

</bundles_post_ra>
